<compile_context>
chip_gen: v6e
topology: v6e:2x2x1
jax: 0.10.0
libtpu: 0.0.40
codegen_flags: <defaults>
</compile_context>

<pallas_src>
import jax
import jax.numpy as jnp
from jax import lax
from jax.experimental import pallas as pl
from jax.experimental.pallas import tpu as pltpu

EPS = 1e-5


# ---------------------------------------------------------------------------
# Fused kernel: single step, whole problem resident in VMEM.
#   x_ref  : (K, M)      stacked channel-major inputs (ReLU applied in-kernel)
#   w_ref  : (C_tot, K)  block-diagonal 1x1-conv weights (zero between branches)
#   gb_ref : (C_tot, 2)  column 0 = gamma, column 1 = beta
#   o_ref  : (C_tot, M)  rows [0, channels) = branch 0, rows [channels, 2*channels) = branch 1
# ---------------------------------------------------------------------------
def _calibrate_kernel(x_ref, w_ref, gb_ref, o_ref):
    x = jnp.maximum(x_ref[...], 0.0)                                   # ReLU (VPU)
    y = jnp.dot(w_ref[...], x, preferred_element_type=jnp.float32)     # 1x1 convs (MXU)

    # BatchNorm, training-mode biased batch stats, per output channel (= per row).
    # Single pass: sum / sumsq lane reductions (XLU), then one fused scale/shift.
    inv_m = 1.0 / y.shape[-1]
    s = jnp.sum(y, axis=-1, keepdims=True)
    ss = jnp.sum(y * y, axis=-1, keepdims=True)
    mean = s * inv_m
    var = ss * inv_m - mean * mean
    gb = gb_ref[...]
    a = gb[:, 0:1] * lax.rsqrt(var + EPS)                              # EUP rsqrt
    b = gb[:, 1:2] - mean * a
    o_ref[...] = (y * a + b).astype(o_ref.dtype)                       # fused scale/shift


# ---------------------------------------------------------------------------
# MaybeCalibrateSize forward (hw[0] == 2*hw[1] and c[1] != channels branches)
# ---------------------------------------------------------------------------
def maybe_calibrate_size(s0, s1, params, channels):
    N, C0, H0, W0 = s0.shape
    N1, C1, H1, W1 = s1.shape
    assert H0 % 2 == 0 and W0 % 2 == 0, "pad-shift path assumes even spatial dims"
    Ho, Wo = H0 // 2, W0 // 2
    assert (N, Ho, Wo) == (N1, H1, W1)
    M = N * Ho * Wo
    c_half = channels // 2
    c_tot = 2 * channels

    # Natural stacked contraction size and its sublane(8)-aligned padded size.
    k_nat = 2 * C0 + C1
    k_pad = -(-k_nat // 8) * 8

    # --- branch 0 inputs: FactorizedReduce applied to relu(s0) --------------
    # path1: AvgPool2d(1, stride=2)                      == even-index subsample
    # path2: F.pad(x,(0,1,0,1))[:, :, 1:, 1:] + stride-2 == odd-index subsample (even H,W)
    # (ReLU is applied in-kernel; it commutes with subsampling and pad-zeros.)
    x_even = s0[:, :, 0::2, 0::2]                                    # (N, C0, Ho, Wo)
    x_odd = s0[:, :, 1::2, 1::2]                                     # (N, C0, Ho, Wo)
    x_fr = jnp.concatenate([x_even, x_odd], axis=1)                  # (N, 2*C0, Ho, Wo)
    x_fr = jnp.transpose(x_fr, (1, 0, 2, 3)).reshape(2 * C0, M)      # channel-major

    # --- branch 1 inputs: ReLUConvBN(1x1) on s1 ------------------------------
    x_rcb = jnp.transpose(s1, (1, 0, 2, 3)).reshape(C1, M)           # channel-major

    # --- stack both branches along the channel/sublane axis ------------------
    # Only (k_pad - k_nat) zero rows are appended (inside the same concat); they
    # multiply zero weight columns, so no common-K re-pad of x is needed.
    x_all = jnp.concatenate(
        [x_fr, x_rcb, jnp.zeros((k_pad - k_nat, M), s0.dtype)], axis=0)  # (k_pad, M)

    # Block-diagonal weight: one dot implements concat([conv1(even), conv2(odd)])
    # for FactorizedReduce AND the branch-1 1x1 conv; branches never mix.
    w_all = jnp.zeros((c_tot, k_pad), jnp.float32)
    w_all = w_all.at[:c_half, :C0].set(params["fr_w1"])
    w_all = w_all.at[c_half:channels, C0:2 * C0].set(params["fr_w2"])
    w_all = w_all.at[channels:, 2 * C0:2 * C0 + C1].set(params["rcb_w"])

    # gamma / beta merged into one (c_tot, 2) input.
    gb_all = jnp.stack(
        [jnp.concatenate([params["fr_gamma"], params["rcb_gamma"]]),
         jnp.concatenate([params["fr_beta"], params["rcb_beta"]])], axis=1)

    out_all = pl.pallas_call(
        _calibrate_kernel,
        out_shape=jax.ShapeDtypeStruct((c_tot, M), jnp.float32),
        in_specs=[
            pl.BlockSpec(memory_space=pltpu.MemorySpace.VMEM),
            pl.BlockSpec(memory_space=pltpu.MemorySpace.VMEM),
            pl.BlockSpec(memory_space=pltpu.MemorySpace.VMEM),
        ],
        out_specs=pl.BlockSpec(memory_space=pltpu.MemorySpace.VMEM),
    )(x_all, w_all, gb_all)

    # channel-major (C, N*H*W) -> NCHW
    out0 = out_all[:channels].reshape(channels, N, Ho, Wo).transpose(1, 0, 2, 3)
    out1 = out_all[channels:].reshape(channels, N1, H1, W1).transpose(1, 0, 2, 3)
    return [out0, out1]


# ---------------------------------------------------------------------------
# Pure-JAX reference mirroring the PyTorch module (no Pallas)
# ---------------------------------------------------------------------------
def _conv1x1_nchw(x, w):
    # x: (N, C_in, H, W), w: (C_out, C_in)
    return jnp.einsum("oc,nchw->nohw", w, x)


def _bn_train_nchw(y, gamma, beta):
    mean = jnp.mean(y, axis=(0, 2, 3), keepdims=True)
    var = jnp.mean((y - mean) ** 2, axis=(0, 2, 3), keepdims=True)
    return ((y - mean) / jnp.sqrt(var + EPS)) * gamma.reshape(1, -1, 1, 1) \
        + beta.reshape(1, -1, 1, 1)


def reference(s0, s1, params, channels):
    # s0 branch: relu -> FactorizedReduce (pad-shift path done literally)
    x = jnp.maximum(s0, 0.0)
    p1 = x[:, :, ::2, ::2]
    xp = jnp.pad(x, ((0, 0), (0, 0), (0, 1), (0, 1)))[:, :, 1:, 1:]
    p2 = xp[:, :, ::2, ::2]
    y = jnp.concatenate([_conv1x1_nchw(p1, params["fr_w1"]),
                         _conv1x1_nchw(p2, params["fr_w2"])], axis=1)
    out0 = _bn_train_nchw(y, params["fr_gamma"], params["fr_beta"])

    # s1 branch: ReLUConvBN(1x1)
    z = _conv1x1_nchw(jnp.maximum(s1, 0.0), params["rcb_w"])
    out1 = _bn_train_nchw(z, params["rcb_gamma"], params["rcb_beta"])
    return [out0, out1]


if __name__ == "__main__":
    # Module config: layers = [[16,16,4], [8,8,6]], channels = 8
    N = 2
    C0, C1 = 4, 6
    HW0, HW1 = 16, 8
    CHANNELS = 8
    C_HALF = CHANNELS // 2

    key = jax.random.PRNGKey(0)
    ks = jax.random.split(key, 9)

    s0 = jax.random.normal(ks[0], (N, C0, HW0, HW0), dtype=jnp.float32)
    s1 = jax.random.normal(ks[1], (N, C1, HW1, HW1), dtype=jnp.float32)

    # PyTorch Conv2d(C_in, C_out, 1, bias=False) weights, squeezed to (C_out, C_in).
    params = {
        "fr_w1": jax.random.normal(ks[2], (C_HALF, C0), jnp.float32) * 0.5,
        "fr_w2": jax.random.normal(ks[3], (C_HALF, C0), jnp.float32) * 0.5,
        "rcb_w": jax.random.normal(ks[4], (CHANNELS, C1), jnp.float32) * 0.5,
        "fr_gamma": jax.random.normal(ks[5], (CHANNELS,), jnp.float32) * 0.1 + 1.0,
        "fr_beta": jax.random.normal(ks[6], (CHANNELS,), jnp.float32) * 0.1,
        "rcb_gamma": jax.random.normal(ks[7], (CHANNELS,), jnp.float32) * 0.1 + 1.0,
        "rcb_beta": jax.random.normal(ks[8], (CHANNELS,), jnp.float32) * 0.1,
    }

    # jit the wrapper so the (tiny) layout glue ops dispatch as one program.
    fwd = jax.jit(lambda a, b, p: maybe_calibrate_size(a, b, p, CHANNELS))
    out0, out1 = fwd(s0, s1, params)
    jax.block_until_ready(out0)
    jax.block_until_ready(out1)

    ref0, ref1 = reference(s0, s1, params, CHANNELS)
    assert out0.shape == (N, CHANNELS, HW1, HW1), out0.shape
    assert out1.shape == (N, CHANNELS, HW1, HW1), out1.shape
    assert jnp.allclose(out0, ref0, atol=1e-4, rtol=1e-4), \
        float(jnp.max(jnp.abs(out0 - ref0)))
    assert jnp.allclose(out1, ref1, atol=1e-4, rtol=1e-4), \
        float(jnp.max(jnp.abs(out1 - ref1)))

    print("KERNEL_OK")
</pallas_src>

<mosaic_0001>
module attributes {stable_mosaic.version = 11 : i64} {
  func.func @_calibrate_kernel(%arg0: memref<16x128xf32, #tpu.memory_space<vmem>>, %arg1: memref<16x16xf32, #tpu.memory_space<vmem>>, %arg2: memref<16x2xf32, #tpu.memory_space<vmem>>, %arg3: memref<16x128xf32, #tpu.memory_space<vmem>>) attributes {dimension_semantics = [], scalar_prefetch = 0 : i64, scratch_operands = 0 : i64, tpu.core_type = #tpu.core_type<tc>} {
    %c0 = arith.constant 0 : index
    %c0_0 = arith.constant 0 : index
    %0 = vector.load %arg0[%c0, %c0_0] : memref<16x128xf32, #tpu.memory_space<vmem>>, vector<16x128xf32>
    %cst = arith.constant 0.000000e+00 : f32
    %1 = vector.broadcast %cst : f32 to vector<16x128xf32>
    %2 = arith.maximumf %0, %1 : vector<16x128xf32>
    %c0_1 = arith.constant 0 : index
    %c0_2 = arith.constant 0 : index
    %3 = vector.load %arg1[%c0_1, %c0_2] : memref<16x16xf32, #tpu.memory_space<vmem>>, vector<16x16xf32>
    %cst_3 = arith.constant dense<0.000000e+00> : vector<16x128xf32>
    %4 = tpu.matmul %3, %2, %cst_3 {dimension_numbers = #tpu.dot_dimension_numbers<[1], [0], [0], [1], [0, 0, 1, 1], [], []>} : vector<16x16xf32>, vector<16x128xf32>, vector<16x128xf32> -> vector<16x128xf32>
    %cst_4 = arith.constant dense<0.000000e+00> : vector<16xf32>
    %5 = vector.multi_reduction <add>, %4, %cst_4 [1] : vector<16x128xf32> to vector<16xf32>
    %6 = vector.shape_cast %5 : vector<16xf32> to vector<16x1xf32>
    %7 = arith.mulf %4, %4 : vector<16x128xf32>
    %cst_5 = arith.constant dense<0.000000e+00> : vector<16xf32>
    %8 = vector.multi_reduction <add>, %7, %cst_5 [1] : vector<16x128xf32> to vector<16xf32>
    %9 = vector.shape_cast %8 : vector<16xf32> to vector<16x1xf32>
    %cst_6 = arith.constant 7.812500e-03 : f32
    %10 = vector.broadcast %cst_6 : f32 to vector<16x1xf32>
    %11 = arith.mulf %6, %10 : vector<16x1xf32>
    %cst_7 = arith.constant 7.812500e-03 : f32
    %12 = vector.broadcast %cst_7 : f32 to vector<16x1xf32>
    %13 = arith.mulf %9, %12 : vector<16x1xf32>
    %14 = arith.mulf %11, %11 : vector<16x1xf32>
    %15 = arith.subf %13, %14 : vector<16x1xf32>
    %c0_8 = arith.constant 0 : index
    %c0_9 = arith.constant 0 : index
    %16 = vector.load %arg2[%c0_8, %c0_9] : memref<16x2xf32, #tpu.memory_space<vmem>>, vector<16x2xf32>
    %17 = vector.extract_strided_slice %16 {offsets = [0, 0], sizes = [16, 1], strides = [1, 1]} : vector<16x2xf32> to vector<16x1xf32>
    %cst_10 = arith.constant 9.99999974E-6 : f32
    %18 = vector.broadcast %cst_10 : f32 to vector<16x1xf32>
    %19 = arith.addf %15, %18 : vector<16x1xf32>
    %20 = math.rsqrt %19 : vector<16x1xf32>
    %21 = arith.mulf %17, %20 : vector<16x1xf32>
    %22 = vector.extract_strided_slice %16 {offsets = [0, 1], sizes = [16, 1], strides = [1, 1]} : vector<16x2xf32> to vector<16x1xf32>
    %23 = arith.mulf %11, %21 : vector<16x1xf32>
    %24 = arith.subf %22, %23 : vector<16x1xf32>
    %25 = vector.broadcast %21 : vector<16x1xf32> to vector<16x128xf32>
    %26 = arith.mulf %4, %25 : vector<16x128xf32>
    %27 = vector.broadcast %24 : vector<16x1xf32> to vector<16x128xf32>
    %28 = arith.addf %26, %27 : vector<16x128xf32>
    %c0_11 = arith.constant 0 : index
    %c0_12 = arith.constant 0 : index
    %29 = vector.load %arg3[%c0_11, %c0_12] : memref<16x128xf32, #tpu.memory_space<vmem>>, vector<16x128xf32>
    tpu.vector_store %arg3[%c0_11, %c0_12], %28 {strides = array<i32>} : memref<16x128xf32, #tpu.memory_space<vmem>>, vector<16x128xf32>,
    return
  }
}

</mosaic_0001>

<bundles_post_ra>
// kernel: _lambda_.1
= control target key start
LH: loop header
LB: loop body
LE: loop exit
PB: predicated region body
PF: predicated region fallthrough
CT: control target
= control target key end

     0   :  { %vm20_vm0 = vcmask 130048   ;;  %v193_v10 = vmov 0   ;;  %v194_v25 = vmov 1   ;;  %s195_s22 = smov 1   ;;  %s240_s0 = inlined_call_operand.vmem [shape: f32[16,128], index: 0, kind: input, shape index: {}]   ;;  %s241_s1 = inlined_call_operand.vmem [shape: f32[16,16], index: 1, kind: input, shape index: {}]   ;;  %s242_s2 = inlined_call_operand.vmem [shape: f32[16,2], index: 2, kind: input, shape index: {}]   ;;  %s243_s3 = inlined_call_operand.vmem [shape: f32[16,128], index: 3, kind: output, shape index: {}]  }
   0x1   :  { %v14_v0 = vld [vmem:[%s240_s0] sm:$0xff]  ;;  %v15_v1 = vld [vmem:[%s240_s0 + $0x8] sm:$0xff]  ;;  %186 = vset.pattern.permute.xlu1 %v193_v10  ;;  %187 = vset.pattern.permute.xlu0 %v194_v25 }
   0x2   :  { %v18_v2 = vld [vmem:[%s241_s1] sm:$0xff]  ;;  %v17_v3 = vmax.f32 %v15_v1, 0.0  ;;  %v16_v4 = vmax.f32 %v14_v0, 0.0  ;;  %v19_v5 = vld [vmem:[%s241_s1 + $0x8] sm:$0xff] }
   0x3   :  { %180 = vmatprep.mubr.msk.f32.mxu0 %vm20_vm0, %v18_v2  ;;  %v120_v26 = vld [vmem:[%s242_s2] sm:$0xff]  ;;  %v121_v29 = vld [vmem:[%s242_s2 + $0x8] sm:$0xff] }
   0x4   :  { %176 = vmatprep.subr.mxu0 %v17_v3 }
   0x5   :  { %177 = vmatpush3.msra.mxu0 %v17_v3 }
   0x6   :  { %178 = vmatprep.subr.mxu0 %v16_v4 }
   0x7   :  { %179 = vmatpush3.msra.mxu0 %v16_v4 }
   0x8   :  { %181 = vmatmul.mubr.msk.f32.vlgmr.msra.gmra.mxu0 %vm20_vm0, %v19_v5 }
  0xc8   :  { %v182_v6 = vpop.f32.mrf.mxu0 }
  0xc9   :  { %v107_v9 = vmul.f32 %v182_v6, %v182_v6 }
  0xca   :  { %v93_v7 = vpop.f32.mrf.mxu0 }
  0xcb   :  { %102 = vadd.xlane.f32.xlu0 %v93_v7  ;;  %v106_v8 = vmul.f32 %v93_v7, %v93_v7 }
  0xcd   :  { %108 = vadd.xlane.f32.xlu1 %v106_v8 }
  0xcf   :  { %104 = vadd.xlane.f32.xlu0 %v182_v6 }
  0xd1   :  { %110 = vadd.xlane.f32.xlu1 %v107_v9 }
 0x154   :  { %v103_v11 = vpop.xlane.xlu0 %102 }
 0x155   :  { %v112_v12 = vmul.f32 0.0078125, %v103_v11 }
 0x156   :  { %v109_v13 = vpop.xlane.xlu1 %108 }
 0x157   :  { %v116_v14 = vmul.f32 %v112_v12, %v112_v12  ;;  %v114_v15 = vmul.f32 0.0078125, %v109_v13 }
 0x158   :  { %v105_v16 = vpop.xlane.xlu0 %104 }
 0x159   :  { %v118_v17 = vsub.f32 %v114_v15, %v116_v14  ;;  %v113_v18 = vmul.f32 0.0078125, %v105_v16 }
 0x15a   :  { %v111_v19 = vpop.xlane.xlu1 %110 }
 0x15b   :  { %v122_v20 = vadd.f32 1e-05, %v118_v17  ;;  %v117_v21 = vmul.f32 %v113_v18, %v113_v18  ;;  %v115_v22 = vmul.f32 0.0078125, %v111_v19 }
 0x15d   :  { %189 = vrsqrt.f32 %v122_v20  ;;  %v119_v23 = vsub.f32 %v115_v22, %v117_v21 }
 0x15f   :  { %v123_v24 = vadd.f32 1e-05, %v119_v23 }
 0x161   :  { %191 = vrsqrt.f32 %v123_v24 }
 0x16a   :  { %v190_v27 = vpop.eup %189 }
 0x16b   :  { %v126_v28 = vmul.f32 %v190_v27, %v120_v26 }
 0x16d   :  { %v128_v30 = vmul.f32 %v126_v28, %v112_v12 }
 0x16e   :  { %v192_v31 = vpop.eup %191 }
 0x16f   :  { %132 = vrot.lane.b32.xlu0 %v128_v30, %s195_s22  ;;  %v127_v32 = vmul.f32 %v192_v31, %v121_v29 }
 0x171   :  { %v129_v33 = vmul.f32 %v127_v32, %v113_v18 }
 0x173   :  { %134 = vrot.lane.b32.xlu1 %v129_v33, %s195_s22 }
 0x177   :  { %142 = vperm.xlu1 %186, %v126_v28  }
 0x17b   :  { %147 = vperm.xlu1 %186, %v127_v32  }
 0x17f   :  { %188 = vset.pattern.permute.xlu1 %v194_v25 }
 0x1e1   :  { %v133_v34 = vpop.permute.xlu0 %132 }
 0x1e2   :  { %v138_v35 = vsub.f32 %v120_v26, %v133_v34 }
 0x1e4   :  { %154 = vperm.xlu0 %187, %v138_v35  }
 0x1e5   :  { %v135_v36 = vpop.permute.xlu1 %134 }
 0x1e6   :  { %v139_v37 = vsub.f32 %v121_v29, %v135_v36 }
 0x1e8   :  { %159 = vperm.xlu1 %188, %v139_v37  }
 0x1f2   :  { %v143_v38 = vpop.permute.xlu1 %142 }
 0x1f3   :  { %v150_v39 = vmul.f32 %v143_v38, %v93_v7 }
 0x1f6   :  { %v148_v40 = vpop.permute.xlu1 %147 }
 0x1f7   :  { %v151_v43 = vmul.f32 %v182_v6, %v148_v40 }
 0x25f   :  { %v155_v41 = vpop.permute.xlu0 %154 }
 0x260   :  { %v162_v42 = vadd.f32 %v155_v41, %v150_v39 }
 0x262   :  { %164 = vst [vmem:[%s243_s3] sm:$0xff] %v162_v42 }
 0x263   :  { %v160_v44 = vpop.permute.xlu1 %159 }
 0x264   :  { %v163_v45 = vadd.f32 %v160_v44, %v151_v43 }
 0x266   :  { %165 = vst [vmem:[%s243_s3 + $0x8] sm:$0xff] %v163_v45 }

</bundles_post_ra>
